<compile_context>
chip_gen: v5e
topology: v5e:2x2
jax: 0.10.0
libtpu: 0.0.40
codegen_flags: <defaults>
</compile_context>

<pallas_src>
import jax
import jax.numpy as jnp
from jax.experimental import pallas as pl
from jax.experimental.pallas import tpu as pltpu

# Weights after list.reverse() in the PyTorch module.
WEIGHTS = (1.0, 1.0 / 4, 1.0 / 8, 1.0 / 16, 1.0 / 32)
NUM_SCALES = len(WEIGHTS)
# (nn.L1Loss / nn.AvgPool2d have no learnable parameters, so nothing to initialize.)


def _avg_pair_matrix(m):
    """(m//2, m) matrix averaging adjacent pairs: out[i] = 0.5*(in[2i] + in[2i+1])."""
    i = jnp.arange(m // 2, dtype=jnp.int32)[:, None]
    j = jnp.arange(m, dtype=jnp.int32)[None, :]
    return jnp.where(j // 2 == i, jnp.float32(0.5), jnp.float32(0.0))


def _make_kernel(scale_factors):
    sf = tuple(float(v) for v in scale_factors)  # static: weight_s / numel_s

    def kernel(x_ref, y_ref,
               plm0, plm1, plm2, plm3,
               prm0, prm1, prm2, prm3,
               out_ref):
        @pl.when(pl.program_id(0) == 0)
        def _init():
            out_ref[0, 0] = jnp.float32(0.0)

        # Pool only the difference (AvgPool2d is linear).
        d = x_ref[...].astype(jnp.float32) - y_ref[...].astype(jnp.float32)
        partial = jnp.float32(sf[0]) * jnp.sum(jnp.abs(d))

        pool_mats = ((plm0, prm0), (plm1, prm1), (plm2, prm2), (plm3, prm3))
        for s, (plm, prm) in enumerate(pool_mats, start=1):
            # AvgPool2d(2): average row pairs (left matmul), then column pairs (right).
            d = jnp.dot(plm[...], d, preferred_element_type=jnp.float32)
            d = jnp.dot(d, prm[...], preferred_element_type=jnp.float32)
            partial = partial + jnp.float32(sf[s]) * jnp.sum(jnp.abs(d))

        out_ref[0, 0] = out_ref[0, 0] + partial

    return kernel


def ml1_loss(x, y, *, target_tile_bytes=2 * 1024 * 1024):
    """x, y: NCHW arrays (PyTorch convention). Returns scalar float32 loss."""
    assert x.shape == y.shape and x.ndim == 4
    n, c, h, w = x.shape
    div = 2 ** (NUM_SCALES - 1)
    assert h % div == 0 and w % div == 0, "H, W must be divisible by 16 for 5 scales"

    rows = n * c * h
    x2d = x.reshape(rows, w)   # keep original dtype in HBM; cast inside the kernel
    y2d = y.reshape(rows, w)

    # Row tile = kb whole (n, c) planes -> pooling never crosses tile boundaries.
    itemsize = jnp.dtype(x.dtype).itemsize
    nc = n * c
    kb = 1
    for cand in range(1, nc + 1):
        if nc % cand == 0 and cand * h * w * itemsize <= target_tile_bytes:
            kb = cand
    tr = kb * h                       # multiple of 16 (h % 16 == 0) -> sublane aligned
    num_tiles = rows // tr

    # Per-scale pooling matrices, bounded by the tile size (largest is (tr/2, tr) f32).
    pl_mats, pr_mats = [], []
    r, cc = tr, w
    for _ in range(NUM_SCALES - 1):
        pl_mats.append(_avg_pair_matrix(r))       # (r/2, r)   row-pair averaging
        pr_mats.append(_avg_pair_matrix(cc).T)    # (cc, cc/2) column-pair averaging
        r //= 2
        cc //= 2

    # weight_s / numel_s so summed per-tile partial sums reproduce the 'mean' reduction.
    scale_factors = [WEIGHTS[s] / float(n * c * (h >> s) * (w >> s))
                     for s in range(NUM_SCALES)]

    data_spec = pl.BlockSpec((tr, w), lambda i: (i, 0))
    const_specs = [pl.BlockSpec(m.shape, lambda i: (0, 0))
                   for m in (*pl_mats, *pr_mats)]

    out = pl.pallas_call(
        _make_kernel(scale_factors),
        out_shape=jax.ShapeDtypeStruct((1, 1), jnp.float32),
        grid=(num_tiles,),
        in_specs=[data_spec, data_spec, *const_specs],
        out_specs=pl.BlockSpec(memory_space=pltpu.MemorySpace.SMEM),
        compiler_params=pltpu.CompilerParams(
            dimension_semantics=("arbitrary",)),   # serial scalar accumulation
    )(x2d, y2d, *pl_mats, *pr_mats)
    return out[0, 0]


# ---------------- pure-JAX reference for validation ----------------
def _avgpool2(a):
    n, c, h, w = a.shape
    return a.reshape(n, c, h // 2, 2, w // 2, 2).mean(axis=(3, 5))


def ml1_loss_ref(x, y):
    loss = jnp.float32(0.0)
    _x, _y = x, y
    for s, wgt in enumerate(WEIGHTS):
        loss = loss + jnp.float32(wgt) * jnp.mean(jnp.abs(_x - _y))
        if s < NUM_SCALES - 1:
            _x, _y = _avgpool2(_x), _avgpool2(_y)
    return loss


if __name__ == "__main__":
    key = jax.random.PRNGKey(0)
    kx, ky = jax.random.split(key)
    x = jax.random.normal(kx, (2, 4, 16, 16), dtype=jnp.float32)
    y = jax.random.normal(ky, (2, 4, 16, 16), dtype=jnp.float32)

    ref = ml1_loss_ref(x, y)

    # Single-tile path.
    out = jax.block_until_ready(ml1_loss(x, y))
    assert jnp.allclose(out, ref, rtol=1e-5, atol=1e-5), (out, ref)

    # Multi-tile (grid accumulation) path: force small tiles.
    out_tiled = jax.block_until_ready(ml1_loss(x, y, target_tile_bytes=1024))
    assert jnp.allclose(out_tiled, ref, rtol=1e-5, atol=1e-5), (out_tiled, ref)

    print("KERNEL_OK")
</pallas_src>

<mosaic_0001>
module attributes {stable_mosaic.version = 11 : i64} {
  func.func @kernel(%arg0: i32, %arg1: memref<128x16xf32, #tpu.memory_space<vmem>>, %arg2: memref<128x16xf32, #tpu.memory_space<vmem>>, %arg3: memref<64x128xf32, #tpu.memory_space<vmem>>, %arg4: memref<32x64xf32, #tpu.memory_space<vmem>>, %arg5: memref<16x32xf32, #tpu.memory_space<vmem>>, %arg6: memref<8x16xf32, #tpu.memory_space<vmem>>, %arg7: memref<16x8xf32, #tpu.memory_space<vmem>>, %arg8: memref<8x4xf32, #tpu.memory_space<vmem>>, %arg9: memref<4x2xf32, #tpu.memory_space<vmem>>, %arg10: memref<2x1xf32, #tpu.memory_space<vmem>>, %arg11: memref<1x1xf32, #tpu.memory_space<smem>>) attributes {dimension_semantics = [#tpu.dimension_semantics<arbitrary>], iteration_bounds = array<i64: 1>, scalar_prefetch = 0 : i64, scratch_operands = 0 : i64, tpu.core_type = #tpu.core_type<tc>, window_params = [{transform_indices = @transform_0, window_bounds = array<i64: 128, 16>}, {transform_indices = @transform_1, window_bounds = array<i64: 128, 16>}, {pipeline_mode = #tpu.pipeline_mode<synchronous>, transform_indices = @transform_2, window_bounds = array<i64: 64, 128>}, {pipeline_mode = #tpu.pipeline_mode<synchronous>, transform_indices = @transform_3, window_bounds = array<i64: 32, 64>}, {pipeline_mode = #tpu.pipeline_mode<synchronous>, transform_indices = @transform_4, window_bounds = array<i64: 16, 32>}, {pipeline_mode = #tpu.pipeline_mode<synchronous>, transform_indices = @transform_5, window_bounds = array<i64: 8, 16>}, {pipeline_mode = #tpu.pipeline_mode<synchronous>, transform_indices = @transform_6, window_bounds = array<i64: 16, 8>}, {pipeline_mode = #tpu.pipeline_mode<synchronous>, transform_indices = @transform_7, window_bounds = array<i64: 8, 4>}, {pipeline_mode = #tpu.pipeline_mode<synchronous>, transform_indices = @transform_8, window_bounds = array<i64: 4, 2>}, {pipeline_mode = #tpu.pipeline_mode<synchronous>, transform_indices = @transform_9, window_bounds = array<i64: 2, 1>}, {transform_indices = @transform_10, window_bounds = array<i64: 1, 1>}]} {
    %c0_i32 = arith.constant 0 : i32
    %0 = arith.cmpi eq, %arg0, %c0_i32 : i32
    %1 = arith.extui %0 : i1 to i32
    %c0_i32_0 = arith.constant 0 : i32
    %2 = arith.cmpi ne, %1, %c0_i32_0 : i32
    scf.if %2 {
      %cst_41 = arith.constant 0.000000e+00 : f32
      %c0_42 = arith.constant 0 : index
      %c0_43 = arith.constant 0 : index
      %59 = memref.load %arg11[%c0_42, %c0_43] : memref<1x1xf32, #tpu.memory_space<smem>>
      memref.store %cst_41, %arg11[%c0_42, %c0_43] : memref<1x1xf32, #tpu.memory_space<smem>>
    } else {
    }
    %c0 = arith.constant 0 : index
    %c0_1 = arith.constant 0 : index
    %3 = vector.load %arg1[%c0, %c0_1] : memref<128x16xf32, #tpu.memory_space<vmem>>, vector<128x16xf32>
    %c0_2 = arith.constant 0 : index
    %c0_3 = arith.constant 0 : index
    %4 = vector.load %arg2[%c0_2, %c0_3] : memref<128x16xf32, #tpu.memory_space<vmem>>, vector<128x16xf32>
    %5 = arith.subf %3, %4 : vector<128x16xf32>
    %6 = math.absf %5 : vector<128x16xf32>
    %7 = vector.shape_cast %6 : vector<128x16xf32> to vector<1x128x16xf32>
    %cst = arith.constant dense<0.000000e+00> : vector<1xf32>
    %8 = vector.multi_reduction <add>, %7, %cst [1, 2] : vector<1x128x16xf32> to vector<1xf32>
    %9 = vector.shape_cast %8 : vector<1xf32> to vector<1x1x1xf32>
    %10 = vector.extract %9[0, 0, 0] : f32 from vector<1x1x1xf32>
    %cst_4 = arith.constant 4.8828125E-4 : f32
    %11 = arith.mulf %cst_4, %10 : f32
    %c0_5 = arith.constant 0 : index
    %c0_6 = arith.constant 0 : index
    %12 = vector.load %arg3[%c0_5, %c0_6] : memref<64x128xf32, #tpu.memory_space<vmem>>, vector<64x128xf32>
    %cst_7 = arith.constant dense<0.000000e+00> : vector<64x16xf32>
    %13 = tpu.matmul %12, %5, %cst_7 {dimension_numbers = #tpu.dot_dimension_numbers<[1], [0], [0], [1], [0, 0, 1, 1], [], []>} : vector<64x128xf32>, vector<128x16xf32>, vector<64x16xf32> -> vector<64x16xf32>
    %c0_8 = arith.constant 0 : index
    %c0_9 = arith.constant 0 : index
    %14 = vector.load %arg7[%c0_8, %c0_9] : memref<16x8xf32, #tpu.memory_space<vmem>>, vector<16x8xf32>
    %cst_10 = arith.constant dense<0.000000e+00> : vector<64x8xf32>
    %15 = tpu.matmul %13, %14, %cst_10 {dimension_numbers = #tpu.dot_dimension_numbers<[1], [0], [0], [1], [0, 0, 1, 1], [], []>} : vector<64x16xf32>, vector<16x8xf32>, vector<64x8xf32> -> vector<64x8xf32>
    %16 = math.absf %15 : vector<64x8xf32>
    %17 = vector.shape_cast %16 : vector<64x8xf32> to vector<1x64x8xf32>
    %cst_11 = arith.constant dense<0.000000e+00> : vector<1xf32>
    %18 = vector.multi_reduction <add>, %17, %cst_11 [1, 2] : vector<1x64x8xf32> to vector<1xf32>
    %19 = vector.shape_cast %18 : vector<1xf32> to vector<1x1x1xf32>
    %20 = vector.extract %19[0, 0, 0] : f32 from vector<1x1x1xf32>
    %cst_12 = arith.constant 4.8828125E-4 : f32
    %21 = arith.mulf %cst_12, %20 : f32
    %22 = arith.addf %11, %21 : f32
    %c0_13 = arith.constant 0 : index
    %c0_14 = arith.constant 0 : index
    %23 = vector.load %arg4[%c0_13, %c0_14] : memref<32x64xf32, #tpu.memory_space<vmem>>, vector<32x64xf32>
    %cst_15 = arith.constant dense<0.000000e+00> : vector<32x8xf32>
    %24 = tpu.matmul %23, %15, %cst_15 {dimension_numbers = #tpu.dot_dimension_numbers<[1], [0], [0], [1], [0, 0, 1, 1], [], []>} : vector<32x64xf32>, vector<64x8xf32>, vector<32x8xf32> -> vector<32x8xf32>
    %c0_16 = arith.constant 0 : index
    %c0_17 = arith.constant 0 : index
    %25 = vector.load %arg8[%c0_16, %c0_17] : memref<8x4xf32, #tpu.memory_space<vmem>>, vector<8x4xf32>
    %cst_18 = arith.constant dense<0.000000e+00> : vector<32x4xf32>
    %26 = tpu.matmul %24, %25, %cst_18 {dimension_numbers = #tpu.dot_dimension_numbers<[1], [0], [0], [1], [0, 0, 1, 1], [], []>} : vector<32x8xf32>, vector<8x4xf32>, vector<32x4xf32> -> vector<32x4xf32>
    %27 = math.absf %26 : vector<32x4xf32>
    %28 = vector.shape_cast %27 : vector<32x4xf32> to vector<1x32x4xf32>
    %cst_19 = arith.constant dense<0.000000e+00> : vector<1xf32>
    %29 = vector.multi_reduction <add>, %28, %cst_19 [1, 2] : vector<1x32x4xf32> to vector<1xf32>
    %30 = vector.shape_cast %29 : vector<1xf32> to vector<1x1x1xf32>
    %31 = vector.extract %30[0, 0, 0] : f32 from vector<1x1x1xf32>
    %cst_20 = arith.constant 9.765625E-4 : f32
    %32 = arith.mulf %cst_20, %31 : f32
    %33 = arith.addf %22, %32 : f32
    %c0_21 = arith.constant 0 : index
    %c0_22 = arith.constant 0 : index
    %34 = vector.load %arg5[%c0_21, %c0_22] : memref<16x32xf32, #tpu.memory_space<vmem>>, vector<16x32xf32>
    %cst_23 = arith.constant dense<0.000000e+00> : vector<16x4xf32>
    %35 = tpu.matmul %34, %26, %cst_23 {dimension_numbers = #tpu.dot_dimension_numbers<[1], [0], [0], [1], [0, 0, 1, 1], [], []>} : vector<16x32xf32>, vector<32x4xf32>, vector<16x4xf32> -> vector<16x4xf32>
    %c0_24 = arith.constant 0 : index
    %c0_25 = arith.constant 0 : index
    %36 = vector.load %arg9[%c0_24, %c0_25] : memref<4x2xf32, #tpu.memory_space<vmem>>, vector<4x2xf32>
    %cst_26 = arith.constant dense<0.000000e+00> : vector<16x2xf32>
    %37 = tpu.matmul %35, %36, %cst_26 {dimension_numbers = #tpu.dot_dimension_numbers<[1], [0], [0], [1], [0, 0, 1, 1], [], []>} : vector<16x4xf32>, vector<4x2xf32>, vector<16x2xf32> -> vector<16x2xf32>
    %38 = math.absf %37 : vector<16x2xf32>
    %39 = vector.shape_cast %38 : vector<16x2xf32> to vector<1x16x2xf32>
    %cst_27 = arith.constant dense<0.000000e+00> : vector<1xf32>
    %40 = vector.multi_reduction <add>, %39, %cst_27 [1, 2] : vector<1x16x2xf32> to vector<1xf32>
    %41 = vector.shape_cast %40 : vector<1xf32> to vector<1x1x1xf32>
    %42 = vector.extract %41[0, 0, 0] : f32 from vector<1x1x1xf32>
    %cst_28 = arith.constant 0.001953125 : f32
    %43 = arith.mulf %cst_28, %42 : f32
    %44 = arith.addf %33, %43 : f32
    %c0_29 = arith.constant 0 : index
    %c0_30 = arith.constant 0 : index
    %45 = vector.load %arg6[%c0_29, %c0_30] : memref<8x16xf32, #tpu.memory_space<vmem>>, vector<8x16xf32>
    %cst_31 = arith.constant dense<0.000000e+00> : vector<8x2xf32>
    %46 = tpu.matmul %45, %37, %cst_31 {dimension_numbers = #tpu.dot_dimension_numbers<[1], [0], [0], [1], [0, 0, 1, 1], [], []>} : vector<8x16xf32>, vector<16x2xf32>, vector<8x2xf32> -> vector<8x2xf32>
    %c0_32 = arith.constant 0 : index
    %c0_33 = arith.constant 0 : index
    %47 = vector.load %arg10[%c0_32, %c0_33] : memref<2x1xf32, #tpu.memory_space<vmem>>, vector<2x1xf32>
    %cst_34 = arith.constant dense<0.000000e+00> : vector<8x1xf32>
    %48 = tpu.matmul %46, %47, %cst_34 {dimension_numbers = #tpu.dot_dimension_numbers<[1], [0], [0], [1], [0, 0, 1, 1], [], []>} : vector<8x2xf32>, vector<2x1xf32>, vector<8x1xf32> -> vector<8x1xf32>
    %49 = math.absf %48 : vector<8x1xf32>
    %50 = vector.shape_cast %49 : vector<8x1xf32> to vector<1x8x1xf32>
    %cst_35 = arith.constant dense<0.000000e+00> : vector<1xf32>
    %51 = vector.multi_reduction <add>, %50, %cst_35 [1, 2] : vector<1x8x1xf32> to vector<1xf32>
    %52 = vector.shape_cast %51 : vector<1xf32> to vector<1x1x1xf32>
    %53 = vector.extract %52[0, 0, 0] : f32 from vector<1x1x1xf32>
    %cst_36 = arith.constant 3.906250e-03 : f32
    %54 = arith.mulf %cst_36, %53 : f32
    %55 = arith.addf %44, %54 : f32
    %c0_37 = arith.constant 0 : index
    %c0_38 = arith.constant 0 : index
    %56 = memref.load %arg11[%c0_37, %c0_38] : memref<1x1xf32, #tpu.memory_space<smem>>
    %57 = arith.addf %56, %55 : f32
    %c0_39 = arith.constant 0 : index
    %c0_40 = arith.constant 0 : index
    %58 = memref.load %arg11[%c0_39, %c0_40] : memref<1x1xf32, #tpu.memory_space<smem>>
    memref.store %57, %arg11[%c0_39, %c0_40] : memref<1x1xf32, #tpu.memory_space<smem>>
    return
  }
  func.func @transform_0(%arg0: i32) -> (i32, i32) {
    %c0_i32 = arith.constant 0 : i32
    %c0_i32_0 = arith.constant 0 : i32
    return %arg0, %c0_i32 : i32, i32
  }
  func.func @transform_1(%arg0: i32) -> (i32, i32) {
    %c0_i32 = arith.constant 0 : i32
    %c0_i32_0 = arith.constant 0 : i32
    return %arg0, %c0_i32 : i32, i32
  }
  func.func @transform_2(%arg0: i32) -> (i32, i32) {
    %c0_i32 = arith.constant 0 : i32
    %c0_i32_0 = arith.constant 0 : i32
    %c0_i32_1 = arith.constant 0 : i32
    return %c0_i32, %c0_i32_0 : i32, i32
  }
  func.func @transform_3(%arg0: i32) -> (i32, i32) {
    %c0_i32 = arith.constant 0 : i32
    %c0_i32_0 = arith.constant 0 : i32
    %c0_i32_1 = arith.constant 0 : i32
    return %c0_i32, %c0_i32_0 : i32, i32
  }
  func.func @transform_4(%arg0: i32) -> (i32, i32) {
    %c0_i32 = arith.constant 0 : i32
    %c0_i32_0 = arith.constant 0 : i32
    %c0_i32_1 = arith.constant 0 : i32
    return %c0_i32, %c0_i32_0 : i32, i32
  }
  func.func @transform_5(%arg0: i32) -> (i32, i32) {
    %c0_i32 = arith.constant 0 : i32
    %c0_i32_0 = arith.constant 0 : i32
    %c0_i32_1 = arith.constant 0 : i32
    return %c0_i32, %c0_i32_0 : i32, i32
  }
  func.func @transform_6(%arg0: i32) -> (i32, i32) {
    %c0_i32 = arith.constant 0 : i32
    %c0_i32_0 = arith.constant 0 : i32
    %c0_i32_1 = arith.constant 0 : i32
    return %c0_i32, %c0_i32_0 : i32, i32
  }
  func.func @transform_7(%arg0: i32) -> (i32, i32) {
    %c0_i32 = arith.constant 0 : i32
    %c0_i32_0 = arith.constant 0 : i32
    %c0_i32_1 = arith.constant 0 : i32
    return %c0_i32, %c0_i32_0 : i32, i32
  }
  func.func @transform_8(%arg0: i32) -> (i32, i32) {
    %c0_i32 = arith.constant 0 : i32
    %c0_i32_0 = arith.constant 0 : i32
    %c0_i32_1 = arith.constant 0 : i32
    return %c0_i32, %c0_i32_0 : i32, i32
  }
  func.func @transform_9(%arg0: i32) -> (i32, i32) {
    %c0_i32 = arith.constant 0 : i32
    %c0_i32_0 = arith.constant 0 : i32
    %c0_i32_1 = arith.constant 0 : i32
    return %c0_i32, %c0_i32_0 : i32, i32
  }
  func.func @transform_10(%arg0: i32) -> (i32, i32) {
    %c0_i32 = arith.constant 0 : i32
    %c0_i32_0 = arith.constant 0 : i32
    %c0_i32_1 = arith.constant 0 : i32
    return %c0_i32, %c0_i32_0 : i32, i32
  }
}

</mosaic_0001>

<bundles_post_ra>
// kernel: tpu_custom_call.1
= control target key start
LH: loop header
LB: loop body
LE: loop exit
PB: predicated region body
PF: predicated region fallthrough
CT: control target
= control target key end

     0   :  { %vm106_vm0 = vcmask 130048   ;;  %s929_s0 = inlined_call_operand.vmem [shape: f32[128,16], index: 0, kind: input, shape index: {}]   ;;  %s930_s1 = inlined_call_operand.vmem [shape: f32[128,16], index: 1, kind: input, shape index: {}]   ;;  %s931_s2 = inlined_call_operand.vmem [shape: f32[64,128], index: 2, kind: input, shape index: {}]   ;;  %s932_s3 = inlined_call_operand.vmem [shape: f32[32,64], index: 3, kind: input, shape index: {}]   ;;  %s933_s4 = inlined_call_operand.vmem [shape: f32[16,32], index: 4, kind: input, shape index: {}]   ;;  %s934_s5 = inlined_call_operand.vmem [shape: f32[8,16], index: 5, kind: input, shape index: {}]   ;;  %s935_s6 = inlined_call_operand.vmem [shape: f32[16,8], index: 6, kind: input, shape index: {}]   ;;  %s936_s7 = inlined_call_operand.vmem [shape: f32[8,4], index: 7, kind: input, shape index: {}]   ;;  %s937_s8 = inlined_call_operand.vmem [shape: f32[4,2], index: 8, kind: input, shape index: {}]   ;;  %s938_s9 = inlined_call_operand.vmem [shape: f32[2,1], index: 9, kind: input, shape index: {}]   ;;  %s939_s10 = inlined_call_operand.hbm [shape: f32[1,1], index: 10, kind: output, shape index: {}]  }
   0x1   :  { %v57_v0 = vld [vmem:[%s929_s0 + $0x78] sm:$0xff]  ;;  %v56_v2 = vld [vmem:[%s929_s0 + $0x70] sm:$0xff]  ;;  %v55_v5 = vld [vmem:[%s929_s0 + $0x68] sm:$0xff] }
   0x2   :  { %v73_v1 = vld [vmem:[%s930_s1 + $0x78] sm:$0xff]  ;;  %v72_v4 = vld [vmem:[%s930_s1 + $0x70] sm:$0xff]  ;;  %v71_v6 = vld [vmem:[%s930_s1 + $0x68] sm:$0xff] }
   0x3   :  { %v693_v3 = vsub.f32 %v57_v0, %v73_v1  ;;  %v704_v7 = vsub.f32 %v56_v2, %v72_v4  ;;  %v54_v8 = vld [vmem:[%s929_s0 + $0x60] sm:$0xff]  ;;  %v713_v10 = vsub.f32 %v55_v5, %v71_v6  ;;  %v53_v11 = vld [vmem:[%s929_s0 + $0x58] sm:$0xff]  ;;  %v52_v14 = vld [vmem:[%s929_s0 + $0x50] sm:$0xff] }
   0x4   :  { %v70_v9 = vld [vmem:[%s930_s1 + $0x60] sm:$0xff]  ;;  %v69_v12 = vld [vmem:[%s930_s1 + $0x58] sm:$0xff]  ;;  %v68_v15 = vld [vmem:[%s930_s1 + $0x50] sm:$0xff] }
   0x5   :  { %156 = vmatpush.msra.mxu0 %v693_v3  ;;  %v722_v13 = vsub.f32 %v54_v8, %v70_v9  ;;  %v731_v16 = vsub.f32 %v53_v11, %v69_v12  ;;  %v51_v17 = vld [vmem:[%s929_s0 + $0x48] sm:$0xff]  ;;  %v50_v19 = vld [vmem:[%s929_s0 + $0x40] sm:$0xff]  ;;  %v746_v21 = vsub.f32 %v52_v14, %v68_v15  ;;  %v45_v22 = vld [vmem:[%s929_s0 + $0x18] sm:$0xff] }
   0x6   :  { %v67_v18 = vld [vmem:[%s930_s1 + $0x48] sm:$0xff]  ;;  %v66_v20 = vld [vmem:[%s930_s1 + $0x40] sm:$0xff]  ;;  %v61_v23 = vld [vmem:[%s930_s1 + $0x18] sm:$0xff] }
   0x7   :  { %157 = vmatpush.msra.mxu0 %v704_v7  ;;  %v44_v24 = vld [vmem:[%s929_s0 + $0x10] sm:$0xff]  ;;  %v43_v26 = vld [vmem:[%s929_s0 + $0x8] sm:$0xff]  ;;  %v767_v28 = vsub.f32 %v51_v17, %v67_v18  ;;  %v49_v29 = vld [vmem:[%s929_s0 + $0x38] sm:$0xff]  ;;  %v788_v37 = vsub.f32 %v50_v19, %v66_v20  ;;  %v77_v40 = vsub.f32 %v45_v22, %v61_v23 }
   0x8   :  { %v60_v25 = vld [vmem:[%s930_s1 + $0x10] sm:$0xff]  ;;  %v59_v27 = vld [vmem:[%s930_s1 + $0x8] sm:$0xff]  ;;  %v65_v30 = vld [vmem:[%s930_s1 + $0x38] sm:$0xff] }
   0x9   :  { %158 = vmatpush.msra.mxu0 %v713_v10  ;;  %v76_v31 = vsub.f32 %v44_v24, %v60_v25  ;;  %v42_v32 = vld [vmem:[%s929_s0] sm:$0xff]  ;;  %v75_v35 = vsub.f32 %v43_v26, %v59_v27  ;;  %v48_v38 = vld [vmem:[%s929_s0 + $0x30] sm:$0xff]  ;;  %v47_v43 = vld [vmem:[%s929_s0 + $0x28] sm:$0xff] }
   0xa   :  { %v46_v33 = vld [vmem:[%s929_s0 + $0x20] sm:$0xff]  ;;  %v64_v39 = vld [vmem:[%s930_s1 + $0x30] sm:$0xff]  ;;  %v63_v44 = vld [vmem:[%s930_s1 + $0x28] sm:$0xff] }
   0xb   :  { %159 = vmatpush.msra.mxu0 %v722_v13  ;;  %v62_v34 = vld [vmem:[%s930_s1 + $0x20] sm:$0xff]  ;;  %v92_v41 = vand.u32 2147483647, %v76_v31  ;;  %v91_v45 = vand.u32 2147483647, %v75_v35 }
   0xc   :  { %v58_v36 = vld [vmem:[%s930_s1] sm:$0xff] }
   0xd   :  { %160 = vmatpush.msra.mxu0 %v731_v16  ;;  %v74_v42 = vsub.f32 %v42_v32, %v58_v36 }
   0xf   :  { %161 = vmatpush.msra.mxu0 %v746_v21 }
  0x10   :  { %15 = vsyncpa [#allocation3], 0  ;;  %v803_v46 = vsub.f32 %v49_v29, %v65_v30  ;;  %v78_v47 = vsub.f32 %v46_v33, %v62_v34  ;;  %v93_v48 = vand.u32 2147483647, %v77_v40  ;;  %v90_v49 = vand.u32 2147483647, %v74_v42 }
  0x11   :  { %162 = vmatpush.msra.mxu0 %v767_v28  ;;  %v80_v50 = vsub.f32 %v48_v38, %v64_v39  ;;  %v108_v51 = vsel %vm106_vm0, %v91_v45, 0.0  ;;  %v79_v52 = vsub.f32 %v47_v43, %v63_v44  ;;  %v110_v54 = vsel %vm106_vm0, %v92_v41, 0.0  ;;  %v148_v5 = vld [vmem:[%s931_s2] sm:$0xff]  ;;  %v149_v6 = vld [vmem:[%s931_s2 + $0x8] sm:$0xff]  ;;  %v150_v8 = vld [vmem:[%s931_s2 + $0x10] sm:$0xff]  ;;  %s568_s1 = sshll.u32 %s939_s10, 4  ;;  %s569_s1 = int_to_ptr.hbm [resolvable:$true] %s568_s1 }
  0x12   :  { %v94_v53 = vand.u32 2147483647, %v78_v47  ;;  %v107_v55 = vsel %vm106_vm0, %v90_v49, 0.0  ;;  %v112_v58 = vsel %vm106_vm0, %v93_v48, 0.0  ;;  %v151_v9 = vld [vmem:[%s931_s2 + $0x18] sm:$0xff]  ;;  %v198_v11 = vld [vmem:[%s935_s6 + $0x8] sm:$0xff] }
  0x13   :  { %163 = vmatpush.msra.mxu0 %v788_v37  ;;  %v109_v56 = vadd.f32 %v108_v51, %v107_v55  ;;  %v95_v57 = vand.u32 2147483647, %v79_v52  ;;  %v96_v60 = vand.u32 2147483647, %v80_v50  ;;  %237 = vmatpush.msra.mxu1 %v198_v11  ;;  %v152_v12 = vld [vmem:[%s931_s2 + $0x20] sm:$0xff]  ;;  %v153_v14 = vld [vmem:[%s931_s2 + $0x28] sm:$0xff] }
  0x14   :  { %v114_v61 = vsel %vm106_vm0, %v94_v53, 0.0  ;;  %v154_v15 = vld [vmem:[%s931_s2 + $0x30] sm:$0xff]  ;;  %v155_v17 = vld [vmem:[%s931_s2 + $0x38] sm:$0xff]  ;;  %v197_v18 = vld [vmem:[%s935_s6] sm:$0xff]  ;;  %v97_v29 = vand.u32 2147483647, %v803_v46 }
  0x15   :  { %164 = vmatpush.msra.mxu0 %v803_v46  ;;  %v111_v59 = vadd.f32 %v110_v54, %v109_v56  ;;  %v116_v63 = vsel %vm106_vm0, %v95_v57, 0.0  ;;  %v118_v1 = vsel %vm106_vm0, %v96_v60, 0.0  ;;  %238 = vmatpush.msra.mxu1 %v197_v18  ;;  %v98_v30 = vand.u32 2147483647, %v788_v37  ;;  %s628_s18 = smov [#allocation2]  }
  0x16   :  { %v99_v32 = vand.u32 2147483647, %v767_v28  ;;  %v120_v33 = vsel %vm106_vm0, %v97_v29, 0.0  ;;  %v100_v34 = vand.u32 2147483647, %v746_v21  ;;  %vm272_vm1 = vcmask 64512  }
  0x17   :  { %165 = vmatpush.msra.mxu0 %v80_v50  ;;  %v113_v62 = vadd.f32 %v112_v58, %v111_v59  ;;  %v101_v38 = vand.u32 2147483647, %v731_v16  ;;  %v102_v41 = vand.u32 2147483647, %v722_v13  ;;  %v103_v45 = vand.u32 2147483647, %v713_v10 }
  0x18   :  { %v124_v39 = vsel %vm106_vm0, %v99_v32, 0.0  ;;  %v126_v37 = vsel %vm106_vm0, %v100_v34, 0.0  ;;  %v105_v13 = vand.u32 2147483647, %v693_v3  ;;  %vm303_vm2 = vcmask 523264   ;;  %v345_v34 = vld [vmem:[%s936_s7] sm:$0xff] }
  0x19   :  { %166 = vmatpush.msra.mxu0 %v79_v52  ;;  %v115_v0 = vadd.f32 %v114_v61, %v113_v62  ;;  %v128_v28 = vsel %vm106_vm0, %v101_v38, 0.0  ;;  %v130_v21 = vsel %vm106_vm0, %v102_v41, 0.0  ;;  %v132_v48 = vsel %vm106_vm0, %v103_v45, 0.0  ;;  %373 = vmatpush.msra.mxu3 %v345_v34 }
  0x1a   :  { %v136_v53 = vsel %vm106_vm0, %v105_v13, 0.0  ;;  %vm391_vm3 = vcmask 31744   ;;  %vm412_vm4 = vcmask 261120   ;;  %vm449_vm5 = vcmask 1043456  }
  0x1b   :  { %167 = vmatpush.msra.mxu0 %v78_v47  ;;  %v117_v2 = vadd.f32 %v116_v63, %v115_v0  ;;  %v104_v47 = vand.u32 2147483647, %v704_v7  ;;  %vm478_vm6 = vcmask 15360   ;;  %vm521_vm7 = vcmask 1041408  }
  0x1c   :  { %vm546_vm8 = vcmask 7168  }
  0x1d   :  { %168 = vmatpush.msra.mxu0 %v77_v40  ;;  %v119_v4 = vadd.f32 %v118_v1, %v117_v2  ;;  %v134_v51 = vsel %vm106_vm0, %v104_v47, 0.0 }
  0x1f   :  { %169 = vmatpush.msra.mxu0 %v76_v31  ;;  %v121_v36 = vadd.f32 %v120_v33, %v119_v4 }
  0x21   :  { %170 = vmatpush.msra.mxu0 %v75_v35  ;;  %v122_v35 = vsel %vm106_vm0, %v98_v30, 0.0 }
  0x22   :  { %v123_v40 = vadd.f32 %v122_v35, %v121_v36 }
  0x23   :  { %171 = vmatpush.msra.mxu0 %v74_v42 }
  0x24   :  { %172 = vmatmul.f32.vlgmr.msra.gmra.mxu0 %v148_v5  ;;  %v125_v43 = vadd.f32 %v124_v39, %v123_v40 }
  0x26   :  { %v127_v44 = vadd.f32 %v126_v37, %v125_v43 }
  0x28   :  { %v129_v46 = vadd.f32 %v128_v28, %v127_v44 }
  0x2a   :  { %v131_v16 = vadd.f32 %v130_v21, %v129_v46 }
  0x2c   :  { %175 = vmatmul.f32.gmra.mxu0 %v149_v6  ;;  %v133_v50 = vadd.f32 %v132_v48, %v131_v16 }
  0x2e   :  { %v135_v52 = vadd.f32 %v134_v51, %v133_v50 }
  0x30   :  { %v137_v54 = vadd.f32 %v136_v53, %v135_v52 }
  0x32   :  { %138 = vadd.xlane.f32.xlu0 %v137_v54 }
  0x34   :  { %178 = vmatmul.f32.gmra.mxu0 %v150_v8 }
  0x3c   :  { %181 = vmatmul.f32.gmra.mxu0 %v151_v9 }
  0x44   :  { %184 = vmatmul.f32.gmra.mxu0 %v152_v12 }
  0x4c   :  { %187 = vmatmul.f32.gmra.mxu0 %v153_v14 }
  0x54   :  { %190 = vmatmul.f32.gmra.mxu0 %v154_v15 }
  0x5c   :  { %193 = vmatmul.f32.gmra.mxu0 %v155_v17 }
  0xa1   :  { %v173_v19 = vpop.f32.mrf.mxu0 }
  0xa2   :  { %578 = vmatmul.msk.f32.vlgmr.msra.gmra.mxu1 %vm106_vm0, %v173_v19 }
  0xa9   :  { %v176_v20 = vpop.f32.mrf.mxu0 }
  0xaa   :  { %579 = vmatmul.msk.f32.gmra.mxu1 %vm106_vm0, %v176_v20 }
  0xb1   :  { %v179_v22 = vpop.f32.mrf.mxu0 }
  0xb2   :  { %580 = vmatmul.msk.f32.gmra.mxu1 %vm106_vm0, %v179_v22  ;;  %v299_v22 = vld [vmem:[%s932_s3] sm:$0xff] }
  0xb9   :  { %v182_v23 = vpop.f32.mrf.mxu0 }
  0xba   :  { %581 = vmatmul.msk.f32.gmra.mxu1 %vm106_vm0, %v182_v23  ;;  %v300_v23 = vld [vmem:[%s932_s3 + $0x8] sm:$0xff] }
  0xc1   :  { %v185_v24 = vpop.f32.mrf.mxu0 }
  0xc2   :  { %582 = vmatmul.msk.f32.gmra.mxu1 %vm106_vm0, %v185_v24  ;;  %v301_v24 = vld [vmem:[%s932_s3 + $0x10] sm:$0xff] }
  0xc9   :  { %v188_v25 = vpop.f32.mrf.mxu0 }
  0xca   :  { %583 = vmatmul.msk.f32.gmra.mxu1 %vm106_vm0, %v188_v25  ;;  %v302_v25 = vld [vmem:[%s932_s3 + $0x18] sm:$0xff] }
  0xd1   :  { %v191_v26 = vpop.f32.mrf.mxu0 }
  0xd2   :  { %584 = vmatmul.msk.f32.gmra.mxu1 %vm106_vm0, %v191_v26  ;;  %v139_v26 = vpop.xlane.xlu0 %138 }
  0xd9   :  { %v194_v27 = vpop.f32.mrf.mxu0 }
  0xda   :  { %585 = vmatmul.msk.f32.gmra.mxu1 %vm106_vm0, %v194_v27  ;;  %v140_v27 = vrot.slane %v139_v26, 4 }
  0xdc   :  { %v141_v29 = vadd.f32 %v140_v27, %v139_v26 }
  0xde   :  { %v142_v30 = vrot.slane %v141_v29, 2 }
 0x11f   :  { %v854_v31 = vpop.f32.mrf.mxu1 }
 0x120   :  { %v264_v7 = vand.u32 2147483647, %v854_v31 }
 0x122   :  { %v273_v3 = vsel %vm272_vm1, %v264_v7, 0.0  ;;  %v442_v7 = vld [vmem:[%s937_s8] sm:$0xf] }
 0x127   :  { %v243_v42 = vpop.f32.mrf.mxu1 }
 0x128   :  { %v265_v57 = vand.u32 2147483647, %v243_v42 }
 0x12a   :  { %v274_v59 = vsel %vm272_vm1, %v265_v57, 0.0  ;;  %v411_v57 = vld [vmem:[%s933_s4 + $0x8] sm:$0xff] }
 0x12b   :  { %v275_v63 = vadd.f32 %v274_v59, %v273_v3 }
 0x12f   :  { %v246_v49 = vpop.f32.mrf.mxu1 }
 0x130   :  { %v266_v58 = vand.u32 2147483647, %v246_v49 }
 0x132   :  { %v276_v61 = vsel %vm272_vm1, %v266_v58, 0.0 }
 0x133   :  { %v277_v4 = vadd.f32 %v276_v61, %v275_v63 }
 0x137   :  { %v249_v10 = vpop.f32.mrf.mxu1 }
 0x138   :  { %v267_v60 = vand.u32 2147483647, %v249_v10 }
 0x13a   :  { %v278_v1 = vsel %vm272_vm1, %v267_v60, 0.0 }
 0x13b   :  { %v279_v8 = vadd.f32 %v278_v1, %v277_v4 }
 0x13f   :  { %v252_v55 = vpop.f32.mrf.mxu1 }
 0x140   :  { %v268_v62 = vand.u32 2147483647, %v252_v55 }
 0x142   :  { %v280_v5 = vsel %vm272_vm1, %v268_v62, 0.0 }
 0x143   :  { %v281_v11 = vadd.f32 %v280_v5, %v279_v8  ;;  %v493_v8 = vld [vmem:[%s934_s5] sm:$0xff] }
 0x147   :  { %v255_v56 = vpop.f32.mrf.mxu1 }
 0x148   :  { %v269_v2 = vand.u32 2147483647, %v255_v56 }
 0x14a   :  { %v282_v9 = vsel %vm272_vm1, %v269_v2, 0.0 }
 0x14b   :  { %v283_v14 = vadd.f32 %v282_v9, %v281_v11 }
 0x14f   :  { %v258_v0 = vpop.f32.mrf.mxu1 }
 0x150   :  { %v270_v6 = vand.u32 2147483647, %v258_v0 }
 0x152   :  { %v284_v12 = vsel %vm272_vm1, %v270_v6, 0.0 }
 0x153   :  { %v285_v18 = vadd.f32 %v284_v12, %v283_v14  ;;  %v517_v14 = vld [vmem:[%s938_s9] sm:$0x3] }
 0x157   :  { %v261_v15 = vpop.f32.mrf.mxu1 }
 0x158   :  { %v271_v17 = vand.u32 2147483647, %v261_v15  ;;  %324 = vmatpush.msra.mxu2 %v261_v15 }
 0x15a   :  { %325 = vmatpush.msra.mxu2 %v258_v0  ;;  %v286_v19 = vsel %vm272_vm1, %v271_v17, 0.0 }
 0x15b   :  { %v287_v20 = vadd.f32 %v286_v19, %v285_v18 }
 0x15c   :  { %326 = vmatpush.msra.mxu2 %v255_v56  ;;  %v410_v56 = vld [vmem:[%s933_s4] sm:$0xff] }
 0x15d   :  { %288 = vadd.xlane.f32.xlu0 %v287_v20 }
 0x15e   :  { %327 = vmatpush.msra.mxu2 %v252_v55 }
 0x160   :  { %328 = vmatpush.msra.mxu2 %v249_v10 }
 0x162   :  { %329 = vmatpush.msra.mxu2 %v246_v49 }
 0x164   :  { %330 = vmatpush.msra.mxu2 %v243_v42 }
 0x166   :  { %331 = vmatpush.msra.mxu2 %v854_v31  ;;  %v143_v31 = vadd.f32 %v142_v30, %v141_v29 }
 0x167   :  { %586 = vmatmul.msk.f32.vlgmr.msra.gmra.mxu2 %vm303_vm2, %v299_v22 }
 0x168   :  { %v144_v32 = vrot.slane %v143_v31, 1  ;;  %596 = vmatpush.msk.msrb.mxu2 %vm449_vm5, %v442_v7 }
 0x16a   :  { %v145_v33 = vadd.f32 %v144_v32, %v143_v31 }
 0x16c   :  { %602 = vpush %v145_v33 }
 0x16f   :  { %587 = vmatmul.msk.f32.gmra.mxu2 %vm303_vm2, %v300_v23 }
 0x177   :  { %588 = vmatmul.msk.f32.gmra.mxu2 %vm303_vm2, %v301_v24 }
 0x17f   :  { %589 = vmatmul.msk.f32.gmra.mxu2 %vm303_vm2, %v302_v25 }
 0x19d   :  { %s603_s5 = spop %602 }
 0x19e   :  { %s147_s27 = smul.f32 0.00048828125, %s603_s5 }
 0x1d0   :  { %v289_v35 = vpop.xlane.xlu0 %288 }
 0x1d1   :  { %v290_v36 = vrot.slane %v289_v35, 4 }
 0x1d3   :  { %v291_v38 = vadd.f32 %v290_v36, %v289_v35 }
 0x1d5   :  { %v292_v39 = vrot.slane %v291_v38, 2 }
 0x1d7   :  { %v293_v40 = vadd.f32 %v292_v39, %v291_v38 }
 0x1d9   :  { %v294_v41 = vrot.slane %v293_v40, 1 }
 0x1db   :  { %v295_v37 = vadd.f32 %v294_v41, %v293_v40 }
 0x1dd   :  { %604 = vpush %v295_v37 }
 0x1ea   :  { %v333_v42 = vpop.f32.mrf.mxu2 }
 0x1eb   :  { %590 = vmatmul.msk.f32.vlgmr.msra.gmra.mxu3 %vm272_vm1, %v333_v42 }
 0x1f2   :  { %v336_v43 = vpop.f32.mrf.mxu2 }
 0x1f3   :  { %591 = vmatmul.msk.f32.gmra.mxu3 %vm272_vm1, %v336_v43 }
 0x1fa   :  { %v339_v28 = vpop.f32.mrf.mxu2 }
 0x1fb   :  { %592 = vmatmul.msk.f32.gmra.mxu3 %vm272_vm1, %v339_v28 }
 0x202   :  { %v342_v44 = vpop.f32.mrf.mxu2 }
 0x203   :  { %593 = vmatmul.msk.f32.gmra.mxu3 %vm272_vm1, %v342_v44 }
 0x20e   :  { %s605_s9 = spop %604 }
 0x20f   :  { %s297_s29 = smul.f32 0.00048828125, %s605_s9 }
 0x211   :  { %s298_s12 = sadd.f32 %s297_s29, %s147_s27 }
 0x26e   :  { %v375_v45 = vpop.f32.mrf.mxu3 }
 0x26f   :  { %v387_v16 = vand.u32 2147483647, %v375_v45 }
 0x271   :  { %v392_v50 = vsel %vm391_vm3, %v387_v16, 0.0 }
 0x276   :  { %v378_v21 = vpop.f32.mrf.mxu3 }
 0x277   :  { %v388_v47 = vand.u32 2147483647, %v378_v21 }
 0x279   :  { %v393_v49 = vsel %vm391_vm3, %v388_v47, 0.0 }
 0x27a   :  { %v394_v52 = vadd.f32 %v393_v49, %v392_v50 }
 0x27e   :  { %v381_v46 = vpop.f32.mrf.mxu3 }
 0x27f   :  { %v389_v48 = vand.u32 2147483647, %v381_v46 }
 0x281   :  { %v395_v13 = vsel %vm391_vm3, %v389_v48, 0.0 }
 0x282   :  { %v396_v54 = vadd.f32 %v395_v13, %v394_v52 }
 0x286   :  { %v384_v51 = vpop.f32.mrf.mxu3 }
 0x287   :  { %v390_v53 = vand.u32 2147483647, %v384_v51  ;;  %431 = vmatpush.msrb.mxu3 %v384_v51 }
 0x289   :  { %432 = vmatpush.msrb.mxu3 %v381_v46  ;;  %v397_v10 = vsel %vm391_vm3, %v390_v53, 0.0 }
 0x28a   :  { %v398_v55 = vadd.f32 %v397_v10, %v396_v54 }
 0x28b   :  { %433 = vmatpush.msrb.mxu3 %v378_v21 }
 0x28c   :  { %399 = vadd.xlane.f32.xlu1 %v398_v55 }
 0x28d   :  { %434 = vmatpush.msrb.mxu3 %v375_v45 }
 0x28e   :  { %594 = vmatmul.msk.f32.vlgmr.msrb.gmra.mxu3 %vm412_vm4, %v410_v56 }
 0x296   :  { %595 = vmatmul.msk.f32.gmra.mxu3 %vm412_vm4, %v411_v57 }
 0x2ff   :  { %v400_v58 = vpop.xlane.xlu1 %399 }
 0x300   :  { %v401_v59 = vrot.slane %v400_v58, 4 }
 0x302   :  { %v402_v60 = vadd.f32 %v401_v59, %v400_v58 }
 0x304   :  { %v403_v3 = vrot.slane %v402_v60, 2 }
 0x306   :  { %v404_v61 = vadd.f32 %v403_v3, %v402_v60 }
 0x308   :  { %v405_v62 = vrot.slane %v404_v61, 1 }
 0x30a   :  { %v406_v63 = vadd.f32 %v405_v62, %v404_v61 }
 0x30c   :  { %606 = vpush %v406_v63 }
 0x311   :  { %v436_v0 = vpop.f32.mrf.mxu3 }
 0x312   :  { %597 = vmatmul.msk.f32.vlgmr.msrb.gmra.mxu2 %vm391_vm3, %v436_v0 }
 0x319   :  { %v439_v1 = vpop.f32.mrf.mxu3 }
 0x31a   :  { %598 = vmatmul.msk.f32.gmra.mxu2 %vm391_vm3, %v439_v1 }
 0x33d   :  { %s607_s28 = spop %606 }
 0x33e   :  { %s408_s11 = smul.f32 0.0009765625, %s607_s28 }
 0x340   :  { %s409_s14 = sadd.f32 %s408_s11, %s298_s12 }
 0x395   :  { %v470_v2 = vpop.f32.mrf.mxu2 }
 0x396   :  { %v476_v4 = vand.u32 2147483647, %v470_v2 }
 0x398   :  { %v479_v9 = vsel %vm478_vm6, %v476_v4, 0.0 }
 0x39d   :  { %v473_v5 = vpop.f32.mrf.mxu2 }
 0x39e   :  { %v477_v6 = vand.u32 2147483647, %v473_v5  ;;  %511 = vmatpush.msra.mxu3 %v473_v5 }
 0x3a0   :  { %512 = vmatpush.msra.mxu3 %v470_v2  ;;  %v480_v11 = vsel %vm478_vm6, %v477_v6, 0.0 }
 0x3a1   :  { %599 = vmatmul.msk.f32.vlgmr.msra.gmra.mxu3 %vm106_vm0, %v493_v8  ;;  %v481_v12 = vadd.f32 %v480_v11, %v479_v9 }
 0x3a2   :  { %600 = vmatpush.msk.msrb.mxu3 %vm521_vm7, %v517_v14 }
 0x3a3   :  { %482 = vadd.xlane.f32.xlu1 %v481_v12 }
 0x416   :  { %v483_v15 = vpop.xlane.xlu1 %482 }
 0x417   :  { %v484_v17 = vrot.slane %v483_v15, 4 }
 0x419   :  { %v485_v18 = vadd.f32 %v484_v17, %v483_v15 }
 0x41b   :  { %v486_v19 = vrot.slane %v485_v18, 2 }
 0x41d   :  { %v487_v20 = vadd.f32 %v486_v19, %v485_v18 }
 0x41f   :  { %v488_v22 = vrot.slane %v487_v20, 1 }
 0x421   :  { %v489_v23 = vadd.f32 %v488_v22, %v487_v20 }
 0x423   :  { %608 = vpush %v489_v23 }
 0x424   :  { %v514_v24 = vpop.f32.mrf.mxu3 }
 0x425   :  { %601 = vmatmul.msk.f32.vlgmr.msrb.gmra.mxu3 %vm478_vm6, %v514_v24 }
 0x454   :  { %s609_s30 = spop %608 }
 0x455   :  { %s491_s13 = smul.f32 0.001953125, %s609_s30 }
 0x457   :  { %s492_s2 = sadd.f32 %s491_s13, %s409_s14 }
 0x4a8   :  { %v542_v25 = vpop.f32.mrf.mxu3 }
 0x4a9   :  { %v545_v26 = vand.u32 2147483647, %v542_v25 }
 0x4ab   :  { %v547_v27 = vsel %vm546_vm8, %v545_v26, 0.0 }
 0x4ac   :  { %548 = vadd.xlane.f32.xlu2 %v547_v27 }
 0x51f   :  { %v549_v29 = vpop.xlane.xlu2 %548 }
 0x520   :  { %v550_v30 = vrot.slane %v549_v29, 4 }
 0x522   :  { %v551_v31 = vadd.f32 %v550_v30, %v549_v29 }
 0x524   :  { %v552_v32 = vrot.slane %v551_v31, 2 }
 0x526   :  { %v553_v33 = vadd.f32 %v552_v32, %v551_v31 }
 0x528   :  { %v554_v34 = vrot.slane %v553_v33, 1 }
 0x52a   :  { %v555_v35 = vadd.f32 %v554_v34, %v553_v33 }
 0x52c   :  { %610 = vpush %v555_v35 }
 0x55d   :  { %s611_s6 = spop %610 }
 0x55e   :  { %s557_s15 = smul.f32 0.00390625, %s611_s6 }
 0x560   :  { %s558_s17 = sadd.f32 %s557_s15, %s492_s2 }
 0x562   :  { %562 = sst [smem:[#allocation2]] %s558_s17 }
 0x563   :  { %571 = dma.smem_to_hbm %s628_s18, 16, %s569_s1, [#allocation3]  }
 0x564   :  { %626 = dma.done.wait [#allocation3], 16  }
 0x565   :  { %627 = vsyncadd [#allocation3], 4294967280 }
 0x566   :  { %576 = sfence }
 0x567   :  { %577 = vsyncpa [#allocation3], 1 }

</bundles_post_ra>
